<compile_context>
chip_gen: v5e
topology: v5e:2x2
jax: 0.10.0
libtpu: 0.0.40
codegen_flags: <defaults>
</compile_context>

<pallas_src>
import jax
import jax.numpy as jnp
from jax.experimental import pallas as pl
from jax.experimental.pallas import tpu as pltpu

BN_EPS = 1e-5          # nn.BatchNorm1d default eps
NORM_EPS = 1e-12       # F.normalize default eps

_SINGLE_BUFFER_OK = None


# --------------------------------------------------------------------------
# Capability probes / tiling helpers
# --------------------------------------------------------------------------
def _probe_kernel(x_ref, o_ref):
    o_ref[...] = x_ref[...] + 1.0


def _single_buffer_supported():
    """Whether this JAX build accepts pl.Buffered(1) on grid-invariant inputs."""
    global _SINGLE_BUFFER_OK
    if _SINGLE_BUFFER_OK is None:
        try:
            fn = pl.pallas_call(
                _probe_kernel,
                out_shape=jax.ShapeDtypeStruct((16, 128), jnp.float32),
                grid=(2,),
                in_specs=[pl.BlockSpec((8, 128), lambda i: (0, 0),
                                       pipeline_mode=pl.Buffered(1))],
                out_specs=pl.BlockSpec((8, 128), lambda i: (i, 0)),
            )
            jax.block_until_ready(fn(jnp.zeros((8, 128), jnp.float32)))
            _SINGLE_BUFFER_OK = True
        except Exception:
            _SINGLE_BUFFER_OK = False
    return _SINGLE_BUFFER_OK


def _vmem_budget_bytes():
    """Generation-aware VMEM budget: ~75% of physical, 48 MiB safe fallback."""
    try:
        cap = int(pltpu.get_tpu_info().vmem_capacity_bytes)
    except Exception:
        cap = 64 * 1024 * 1024          # v7x physical VMEM (smallest generation)
    return (cap * 3) // 4


def _pick_block_b(batch, d_in, hidden, d_out, mm_bytes, budget):
    """Largest MXU-friendly batch tile that fits the VMEM budget.

    Conservatively assumes double-buffered resident weights (the single-buffer
    probe may halve that) and accounts for the in-kernel f32 temporaries that
    the BlockSpec pipeline itself does not allocate.
    """
    resident = 2 * (d_in * hidden + hidden * d_out) * mm_bytes + 4 * hidden * 4
    # Per-batch-row VMEM bytes, max over the two phases:
    phase1 = 2 * (d_in + hidden) * mm_bytes + 2 * hidden * 4
    phase2 = 2 * hidden * mm_bytes + 2 * d_out * 4 + 2 * hidden * 4 + 2 * d_out * 4
    per_row = max(phase1, phase2)
    tb_max = max(budget - resident, 0) // per_row
    cap = -(-batch // 16) * 16          # don't allocate tiles much larger than the batch
    for tb in (1024, 512, 256, 128, 64, 32, 16):
        if tb <= tb_max and tb <= cap:
            return tb
    return 16


# --------------------------------------------------------------------------
# Kernels
# --------------------------------------------------------------------------
def _stats_kernel(x_ref, w1_ref, h_ref, psum_ref, psumsq_ref):
    """Phase 1: h = x @ w1 (MXU, f32 accumulate) + per-tile feature sum / sumsq."""
    h = jnp.dot(x_ref[...], w1_ref[...], preferred_element_type=jnp.float32)
    # bf16 in production: halves the B x H HBM round-trip between phases.
    h_ref[...] = h.astype(h_ref.dtype)
    # Statistics from the f32 accumulator (before the downcast).
    psum_ref[0] = jnp.sum(h, axis=0, keepdims=True)
    psumsq_ref[0] = jnp.sum(h * h, axis=0, keepdims=True)


def _head_kernel(h_ref, scale_ref, shift_ref, w2_ref, o_ref):
    """Phase 2: folded BN affine -> ReLU -> y = r @ w2 -> abs -> L2 normalize."""
    h = h_ref[...].astype(jnp.float32)
    r = jnp.maximum(h * scale_ref[...] + shift_ref[...], 0.0)   # BN as a single FMA
    y = jnp.dot(r.astype(w2_ref.dtype), w2_ref[...],
                preferred_element_type=jnp.float32)
    y = jnp.abs(y)
    # F.normalize(dim=1):  y / max(||y||, eps) == y * rsqrt(max(||y||^2, eps^2))
    ssq = jnp.sum(y * y, axis=1, keepdims=True)
    o_ref[...] = y * jax.lax.rsqrt(jnp.maximum(ssq, NORM_EPS * NORM_EPS))


# --------------------------------------------------------------------------
# Wrapper
# --------------------------------------------------------------------------
def projection_head(x, w1, b1, gamma, beta, w2, *, block_b=None,
                    mm_dtype=jnp.bfloat16):
    """x: (B, D_in) f32. w1: (D_in, H), b1/gamma/beta: (1, H), w2: (H, D_out).

    b1 is accepted for parity with nn.Linear but unused: a bias followed by
    train-mode BatchNorm (batch statistics) cancels exactly in the forward.
    """
    del b1
    B, D_in = x.shape
    H = w1.shape[1]
    D_out = w2.shape[1]
    mm_bytes = jnp.dtype(mm_dtype).itemsize

    budget = _vmem_budget_bytes()
    tb = block_b if block_b is not None else _pick_block_b(
        B, D_in, H, D_out, mm_bytes, budget)
    tb = max(16, -(-tb // 16) * 16)        # sublane-packing friendly (bf16 tile = 16)

    # Pad the batch to a tile multiple; zero rows contribute exactly 0 to the
    # BN sums (stats divide by the real B) and are sliced off at the end.
    num_tiles = pl.cdiv(B, tb)
    B_pad = num_tiles * tb

    xc = x.astype(mm_dtype)
    if B_pad != B:
        xc = jnp.pad(xc, ((0, B_pad - B), (0, 0)))
    # Pre-cast weights once in the wrapper (halves their HBM DMA bytes and
    # removes per-grid-step recasts of the resident weights).
    w1c = w1.astype(mm_dtype)
    w2c = w2.astype(mm_dtype)

    sb = _single_buffer_supported()

    def const_spec(shape):
        idx = lambda i, _n=len(shape): (0,) * _n
        if sb:
            return pl.BlockSpec(shape, idx, pipeline_mode=pl.Buffered(1))
        return pl.BlockSpec(shape, idx)

    params = pltpu.CompilerParams(
        dimension_semantics=("parallel",),     # both phases are tile-parallel
        vmem_limit_bytes=budget)

    # ---- Phase 1: hidden matmul + per-tile batch statistics ---------------
    h, psum, psumsq = pl.pallas_call(
        _stats_kernel,
        out_shape=(jax.ShapeDtypeStruct((B_pad, H), mm_dtype),
                   jax.ShapeDtypeStruct((num_tiles, 1, H), jnp.float32),
                   jax.ShapeDtypeStruct((num_tiles, 1, H), jnp.float32)),
        grid=(num_tiles,),
        in_specs=[pl.BlockSpec((tb, D_in), lambda i: (i, 0)),   # x tile (pipelined)
                  const_spec((D_in, H))],                       # w1 resident
        out_specs=(pl.BlockSpec((tb, H), lambda i: (i, 0)),     # h tile
                   pl.BlockSpec((1, 1, H), lambda i: (i, 0, 0)),  # partial sums
                   pl.BlockSpec((1, 1, H), lambda i: (i, 0, 0))),
        compiler_params=params,
    )(xc, w1c)

    # Tiny (num_tiles,1,H) reduction + BN fold into one scale/shift (f32).
    s = jnp.sum(psum, axis=0)       # (1, H)
    ss = jnp.sum(psumsq, axis=0)    # (1, H)
    mean = s / B
    # One-pass variance; clamp guards tiny negatives from f32 cancellation.
    var = jnp.maximum(ss / B - mean * mean, 0.0)
    scale = gamma * jax.lax.rsqrt(var + BN_EPS)
    shift = beta - mean * scale

    # ---- Phase 2: BN + ReLU + output matmul + abs + normalize -------------
    out = pl.pallas_call(
        _head_kernel,
        out_shape=jax.ShapeDtypeStruct((B_pad, D_out), jnp.float32),
        grid=(num_tiles,),
        in_specs=[pl.BlockSpec((tb, H), lambda i: (i, 0)),      # h tile (pipelined)
                  const_spec((1, H)),                           # BN scale
                  const_spec((1, H)),                           # BN shift
                  const_spec((H, D_out))],                      # w2 resident
        out_specs=pl.BlockSpec((tb, D_out), lambda i: (i, 0)),
        compiler_params=params,
    )(h, scale, shift, w2c)

    return out[:B] if B_pad != B else out


# --------------------------------------------------------------------------
# Pure-JAX reference (matches PyTorch forward in train mode)
# --------------------------------------------------------------------------
def reference(x, w1, b1, gamma, beta, w2):
    h = x @ w1 + b1
    mean = h.mean(axis=0, keepdims=True)
    var = ((h - mean) ** 2).mean(axis=0, keepdims=True)
    hbn = (h - mean) / jnp.sqrt(var + BN_EPS) * gamma + beta
    r = jnp.maximum(hbn, 0.0)
    y = jnp.abs(r @ w2)
    n = jnp.sqrt(jnp.sum(y * y, axis=1, keepdims=True))
    return y / jnp.maximum(n, NORM_EPS)


if __name__ == "__main__":
    # Small, module-consistent, lane-dense shapes (module defaults 1280/1280/128;
    # here D_in=H=256, D_out=128).  B=24 is deliberately not a tile multiple so
    # the padding path and multi-tile BN statistics are both exercised.
    B, D_IN, H, D_OUT = 24, 256, 256, 128

    key = jax.random.PRNGKey(0)
    kx, kw1, kb1, kg, kbe, kw2 = jax.random.split(key, 6)

    x = jax.random.normal(kx, (B, D_IN), dtype=jnp.float32)
    lim1 = 1.0 / (D_IN ** 0.5)
    w1 = jax.random.uniform(kw1, (D_IN, H), jnp.float32, -lim1, lim1)
    b1 = jax.random.uniform(kb1, (1, H), jnp.float32, -lim1, lim1)
    gamma = jax.random.uniform(kg, (1, H), jnp.float32, 0.5, 1.5)
    beta = 0.1 * jax.random.normal(kbe, (1, H), dtype=jnp.float32)
    lim2 = 1.0 / (H ** 0.5)
    w2 = jax.random.uniform(kw2, (H, D_OUT), jnp.float32, -lim2, lim2)

    ref = reference(x, w1, b1, gamma, beta, w2)

    # f32 MXU path: tight numerical check of the kernel semantics.
    out_f32 = projection_head(x, w1, b1, gamma, beta, w2,
                              block_b=16, mm_dtype=jnp.float32)
    out_f32 = jax.block_until_ready(out_f32)
    assert out_f32.shape == (B, D_OUT)
    err32 = float(jnp.max(jnp.abs(out_f32 - ref)))
    assert jnp.allclose(out_f32, ref, atol=1e-4, rtol=1e-4), f"f32 max err={err32}"
    assert jnp.allclose(jnp.linalg.norm(out_f32, axis=1), 1.0, atol=1e-4)

    # bf16 production path (default): looser tolerance vs the f32 reference.
    out_bf16 = projection_head(x, w1, b1, gamma, beta, w2, block_b=16)
    out_bf16 = jax.block_until_ready(out_bf16)
    assert out_bf16.shape == (B, D_OUT)
    err16 = float(jnp.max(jnp.abs(out_bf16 - ref)))
    assert jnp.allclose(out_bf16, ref, atol=5e-2, rtol=5e-2), f"bf16 max err={err16}"
    assert jnp.allclose(jnp.linalg.norm(out_bf16, axis=1), 1.0, atol=1e-3)

    print("KERNEL_OK")
</pallas_src>

<mosaic_0001>
module attributes {stable_mosaic.version = 11 : i64} {
  func.func @_probe_kernel(%arg0: i32, %arg1: memref<8x128xf32, #tpu.memory_space<vmem>>, %arg2: memref<8x128xf32, #tpu.memory_space<vmem>>) attributes {dimension_semantics = [#tpu.dimension_semantics<arbitrary>], iteration_bounds = array<i64: 2>, scalar_prefetch = 0 : i64, scratch_operands = 0 : i64, tpu.core_type = #tpu.core_type<tc>, window_params = [{pipeline_mode = #tpu.pipeline_mode<synchronous>, transform_indices = @transform_0, window_bounds = array<i64: 8, 128>}, {transform_indices = @transform_1, window_bounds = array<i64: 8, 128>}]} {
    %c0 = arith.constant 0 : index
    %c0_0 = arith.constant 0 : index
    %0 = vector.load %arg1[%c0, %c0_0] : memref<8x128xf32, #tpu.memory_space<vmem>>, vector<8x128xf32>
    %cst = arith.constant 1.000000e+00 : f32
    %1 = vector.broadcast %cst : f32 to vector<8x128xf32>
    %2 = arith.addf %0, %1 : vector<8x128xf32>
    %c0_1 = arith.constant 0 : index
    %c0_2 = arith.constant 0 : index
    %3 = vector.load %arg2[%c0_1, %c0_2] : memref<8x128xf32, #tpu.memory_space<vmem>>, vector<8x128xf32>
    tpu.vector_store %arg2[%c0_1, %c0_2], %2 {strides = array<i32>} : memref<8x128xf32, #tpu.memory_space<vmem>>, vector<8x128xf32>,
    return
  }
  func.func @transform_0(%arg0: i32) -> (i32, i32) {
    %c0_i32 = arith.constant 0 : i32
    %c0_i32_0 = arith.constant 0 : i32
    %c0_i32_1 = arith.constant 0 : i32
    return %c0_i32, %c0_i32_0 : i32, i32
  }
  func.func @transform_1(%arg0: i32) -> (i32, i32) {
    %c0_i32 = arith.constant 0 : i32
    %c0_i32_0 = arith.constant 0 : i32
    return %arg0, %c0_i32 : i32, i32
  }
}

module attributes {stable_mosaic.version = 11 : i64} {
  func.func @_stats_kernel(%arg0: i32, %arg1: memref<16x256xf32, #tpu.memory_space<vmem>>, %arg2: memref<256x256xf32, #tpu.memory_space<vmem>>, %arg3: memref<16x256xf32, #tpu.memory_space<vmem>>, %arg4: memref<1x1x256xf32, #tpu.memory_space<vmem>>, %arg5: memref<1x1x256xf32, #tpu.memory_space<vmem>>) attributes {dimension_semantics = [#tpu.dimension_semantics<parallel>], iteration_bounds = array<i64: 2>, scalar_prefetch = 0 : i64, scratch_operands = 0 : i64, tpu.core_type = #tpu.core_type<tc>, window_params = [{transform_indices = @transform_0, window_bounds = array<i64: 16, 256>}, {pipeline_mode = #tpu.pipeline_mode<synchronous>, transform_indices = @transform_1, window_bounds = array<i64: 256, 256>}, {transform_indices = @transform_2, window_bounds = array<i64: 16, 256>}, {transform_indices = @transform_3, window_bounds = array<i64: 1, 1, 256>}, {transform_indices = @transform_4, window_bounds = array<i64: 1, 1, 256>}]} {
    %c0 = arith.constant 0 : index
    %c0_0 = arith.constant 0 : index
    %0 = vector.load %arg1[%c0, %c0_0] : memref<16x256xf32, #tpu.memory_space<vmem>>, vector<16x256xf32>
    %c0_1 = arith.constant 0 : index
    %c0_2 = arith.constant 0 : index
    %1 = vector.load %arg2[%c0_1, %c0_2] : memref<256x256xf32, #tpu.memory_space<vmem>>, vector<256x256xf32>
    %cst = arith.constant dense<0.000000e+00> : vector<16x256xf32>
    %2 = tpu.matmul %0, %1, %cst {dimension_numbers = #tpu.dot_dimension_numbers<[1], [0], [0], [1], [0, 0, 1, 1], [], []>} : vector<16x256xf32>, vector<256x256xf32>, vector<16x256xf32> -> vector<16x256xf32>
    %c0_3 = arith.constant 0 : index
    %c0_4 = arith.constant 0 : index
    %3 = vector.load %arg3[%c0_3, %c0_4] : memref<16x256xf32, #tpu.memory_space<vmem>>, vector<16x256xf32>
    tpu.vector_store %arg3[%c0_3, %c0_4], %2 {strides = array<i32>} : memref<16x256xf32, #tpu.memory_space<vmem>>, vector<16x256xf32>,
    %cst_5 = arith.constant dense<0.000000e+00> : vector<256xf32>
    %4 = vector.multi_reduction <add>, %2, %cst_5 [0] : vector<16x256xf32> to vector<256xf32>
    %5 = vector.shape_cast %4 : vector<256xf32> to vector<1x256xf32>
    %c0_6 = arith.constant 0 : index
    %c0_7 = arith.constant 0 : index
    %c0_8 = arith.constant 0 : index
    %6 = vector.load %arg4[%c0_6, %c0_7, %c0_8] : memref<1x1x256xf32, #tpu.memory_space<vmem>>, vector<1x1x256xf32>
    %7 = vector.shape_cast %6 : vector<1x1x256xf32> to vector<1x256xf32>
    %8 = vector.shape_cast %5 : vector<1x256xf32> to vector<1x1x256xf32>
    tpu.vector_store %arg4[%c0_6, %c0_7, %c0_8], %8 {strides = array<i32>} : memref<1x1x256xf32, #tpu.memory_space<vmem>>, vector<1x1x256xf32>,
    %9 = arith.mulf %2, %2 : vector<16x256xf32>
    %cst_9 = arith.constant dense<0.000000e+00> : vector<256xf32>
    %10 = vector.multi_reduction <add>, %9, %cst_9 [0] : vector<16x256xf32> to vector<256xf32>
    %11 = vector.shape_cast %10 : vector<256xf32> to vector<1x256xf32>
    %c0_10 = arith.constant 0 : index
    %c0_11 = arith.constant 0 : index
    %c0_12 = arith.constant 0 : index
    %12 = vector.load %arg5[%c0_10, %c0_11, %c0_12] : memref<1x1x256xf32, #tpu.memory_space<vmem>>, vector<1x1x256xf32>
    %13 = vector.shape_cast %12 : vector<1x1x256xf32> to vector<1x256xf32>
    %14 = vector.shape_cast %11 : vector<1x256xf32> to vector<1x1x256xf32>
    tpu.vector_store %arg5[%c0_10, %c0_11, %c0_12], %14 {strides = array<i32>} : memref<1x1x256xf32, #tpu.memory_space<vmem>>, vector<1x1x256xf32>,
    return
  }
  func.func @transform_0(%arg0: i32) -> (i32, i32) {
    %c0_i32 = arith.constant 0 : i32
    %c0_i32_0 = arith.constant 0 : i32
    return %arg0, %c0_i32 : i32, i32
  }
  func.func @transform_1(%arg0: i32) -> (i32, i32) {
    %c0_i32 = arith.constant 0 : i32
    %c0_i32_0 = arith.constant 0 : i32
    %c0_i32_1 = arith.constant 0 : i32
    return %c0_i32, %c0_i32_0 : i32, i32
  }
  func.func @transform_2(%arg0: i32) -> (i32, i32) {
    %c0_i32 = arith.constant 0 : i32
    %c0_i32_0 = arith.constant 0 : i32
    return %arg0, %c0_i32 : i32, i32
  }
  func.func @transform_3(%arg0: i32) -> (i32, i32, i32) {
    %c0_i32 = arith.constant 0 : i32
    %c0_i32_0 = arith.constant 0 : i32
    %c0_i32_1 = arith.constant 0 : i32
    return %arg0, %c0_i32, %c0_i32_0 : i32, i32, i32
  }
  func.func @transform_4(%arg0: i32) -> (i32, i32, i32) {
    %c0_i32 = arith.constant 0 : i32
    %c0_i32_0 = arith.constant 0 : i32
    %c0_i32_1 = arith.constant 0 : i32
    return %arg0, %c0_i32, %c0_i32_0 : i32, i32, i32
  }
}

</mosaic_0001>

<bundles_post_ra>
// kernel: tpu_custom_call.1
= control target key start
LH: loop header
LB: loop body
LE: loop exit
PB: predicated region body
PF: predicated region fallthrough
CT: control target
= control target key end

     0   :  { %6 = vsyncpa [#allocation3], 0  ;;  %s441_s0 = inlined_call_operand.hbm [shape: f32[8,128], index: 0, kind: input, shape index: {}]   ;;  %s442_s1 = inlined_call_operand.hbm [shape: f32[16,128], index: 1, kind: output, shape index: {}]  }
   0x1   :  { %7 = vsyncpa [#allocation4], 0 }
   0x2   :  { %9 = vsyncpa [#allocation4 + $0x1], 0  ;;  %s357_s6 = smov 0   ;;  %s359_s7 = smov 0  }
   0x3   :  { %s361_s8 = smov 0   ;;  %s363_s9 = smov 0  }
   0x4 LB: > { %s378_s10 = sadd.s32 4294967295, %s344_s9   ;;  %s188_s11 = sadd.s32 4294967294, %s344_s9   ;;  %s344_s9 = sphi %s363_s9, %s448_s9   ;;  %s340_s8 = sphi %s361_s8, %s447_s8   ;;  %s336_s7 = sphi %s359_s7, %s446_s7   ;;  %s332_s6 = sphi %s357_s6, %s445_s6  }
   0x5   : > { %s382_s12 = sadd.s32 1, %s344_s9   ;;  %s43_s13 = sadd.s32 1, %s340_s8 }
   0x6   : > { %s40_s14 = ssub.s32 %s344_s9, %s382_s12  ;;  %p53_p0 = scmp.ne.s32.totalorder %s340_s8, %s336_s7 }
   0x7   : > { %p41_p1 = scmp.eq.s32.totalorder %s40_s14, 0  ;;  %p54_p2 = scmp.eq.s32.totalorder %s378_s10, 1 }
   0x8   : > { %p59_p3 = scmp.ne.s32.totalorder %s336_s7, %s332_s6  ;;  %p60_p4 = scmp.eq.s32.totalorder %s188_s11, 1 }
   0x9   : > { %s393_s15 = scalar_select %p41_p1, %s340_s8, %s43_s13  }
   0xa   : > { %p395_p5 = por %p54_p2, %p53_p0  ;;  %p399_p6 = por %p60_p4, %p59_p3 }
   0xb   : > { %p189_p7 = scmp.ge.s32.totalorder %s344_s9, 1  ;;  %p67_p8 = scmp.lt.s32.totalorder %s344_s9, 3 }
   0xc   : > { %p212_p9 = scmp.eq.s32.totalorder %s378_s10, 0  ;;  %s79_s20 = sshll.u32 %s441_s0, 4  ;;  %s80_s20 = int_to_ptr.hbm [resolvable:$true] %s79_s20 }
   0xd   : > { %p68_p10 = pnand %p189_p7, %p67_p8  ;;  %s346_s21 = smov [#allocation2]  }
   0xe   : > { %s81_s22 = sshll.u32 %s346_s21, 4  ;;  %s82_s22 = int_to_ptr.vmem [resolvable:$true] %s81_s22 }
   0xf   : > { %p204_p11 = pneg %p68_p10  ;;  %94 = sbr.rel (%p68_p10) target bundleno = 37 (0x25), region = 24 }
  0x11   : > { %p205_p12 = pnand %p212_p9, %p204_p11 }
  0x13   : > { %207 = dma.hbm_to_vmem [thread:$0]  (!%p205_p12), %s80_s20, 128, %s82_s22, [#allocation3]  }
  0x14   : > { %323 = dma.done.wait (%p212_p9), [#allocation3], 128  }
  0x15   : > { %325 = vsyncadd (%p212_p9), [#allocation3], 4294967168  ;;  %s107_s23 = sand.u32 1, %s336_s7   ;;  %s195_s24 = sshll.u32 %s378_s10, 3  ;;  %v110_v0 = vld [vmem:[#allocation2] sm:$0xff] }
  0x16   : > { %s193_s25 = sshll.u32 %s107_s23, 3  ;;  %s124_s28 = scalar_lea.hbm %s442_s1, %s195_s24  ;;  %v111_v1 = vadd.f32 1.0, %v110_v0 }
  0x17   : > { %s109_s29 = scalar_lea.vmem [#allocation5], %s193_s25  ;;  %s128_s2 = sshll.u32 %s124_s28, 4  ;;  %s129_s2 = int_to_ptr.hbm [resolvable:$true] %s128_s2 }
  0x18   : > { %s126_s30 = sshll.u32 %s109_s29, 4  ;;  %112 = vst [vmem:[%s109_s29] sm:$0xff] %v111_v1  ;;  %s114_s3 = scalar_lea.sflag [#allocation4], %s107_s23  ;;  %s127_s30 = int_to_ptr.vmem [resolvable:$true] %s126_s30 }
  0x19   : > { %s292_s4 = sshra.s32 %s129_s2, 4  ;;  %s298_s13 = scalar_lea.hbm %s442_s1, 16  ;;  %s293_s4 = int_to_ptr.hbm [resolvable:$true] %s292_s4 }
  0x1a   : > { %s294_s5 = scalar_lea.hbm %s293_s4, 8  ;;  %p299_p2 = scmp.lt.s32.totalorder %s293_s4, %s442_s1 }
  0x1b   : > { %p295_p13 = scmp.ne.s32.totalorder %s293_s4, %s294_s5  ;;  %p300_p3 = scmp.lt.s32.totalorder %s298_s13, %s294_s5 }
  0x1d   : > { %p296_p0 = pnand %p295_p13, %p395_p5  ;;  %p301_p4 = por %p300_p3, %p299_p2 }
  0x1f   : > { %p297_p1 = pneg %p296_p0 }
  0x21   : > { %p302_p7 = pnand %p301_p4, %p297_p1 }
  0x23   : > { %305 = shalt.err (!%p302_p7)
}
  0x24   : > { %202 = dma.vmem_to_hbm [thread:$0]  (%p395_p5), %s127_s30, 128, %s129_s2, %s114_s3  }
  0x25 PF: > { %p214_p8 = scmp.ge.s32.totalorder %s344_s9, 2  ;;  %s140_s19 = sand.u32 1, %s332_s6  }
  0x26   : > { %s141_s20 = scalar_lea.sflag [#allocation4], %s140_s19 }
  0x27   : > { %p209_p9 = pnand %p214_p8, %p399_p6 }
  0x29   : > { %p210_p10 = pneg %p209_p9 }
  0x2b   : > { %327 = dma.done.wait (%p210_p10), %s141_s20, 128  }
  0x2c   : > { %329 = vsyncadd (%p210_p10), %s141_s20, 4294967168  ;;  %p12_p11 = scmp.ge.s32.totalorder %s382_s12, 4   ;;  %s445_s6 = smov %s336_s7 }
  0x2d   : > { %s446_s7 = smov %s340_s8  ;;  %s447_s8 = smov %s393_s15 }
  0x2e   : > { %s448_s9 = smov %s382_s12  ;;  %14 = sbr.rel (!%p12_p11) target bundleno = 4 (0x4), region = 61 }
  0x33   :  { %147 = vsyncpa [#allocation3], 1 }
  0x34   :  { %149 = vsyncpa [#allocation3 + $0x1], 1 }
  0x35   :  { %150 = vsyncpa [#allocation4], 1 }
  0x36   :  { %152 = vsyncpa [#allocation4 + $0x1], 1 }

// kernel: tpu_custom_call.1
= control target key start
LH: loop header
LB: loop body
LE: loop exit
PB: predicated region body
PF: predicated region fallthrough
CT: control target
= control target key end

     0   :  { %10 = vsyncpa [#allocation3], 0  ;;  %s1202_s0 = inlined_call_operand.hbm [shape: f32[32,256], index: 0, kind: input, shape index: {}]   ;;  %s1203_s1 = inlined_call_operand.hbm [shape: f32[256,256], index: 1, kind: input, shape index: {}]   ;;  %s1204_s2 = inlined_call_operand.hbm [shape: f32[32,256], index: 2, kind: output, shape index: {0}]   ;;  %s1205_s3 = inlined_call_operand.hbm [shape: f32[2,1,256], index: 3, kind: output, shape index: {1}]   ;;  %s1206_s4 = inlined_call_operand.hbm [shape: f32[2,1,256], index: 4, kind: output, shape index: {2}]  }
   0x1   :  { %12 = vsyncpa [#allocation3 + $0x1], 0 }
   0x2   :  { %13 = vsyncpa [#allocation6], 0 }
   0x3   :  { %14 = vsyncpa [#allocation4], 0 }
   0x4   :  { %16 = vsyncpa [#allocation4 + $0x1], 0 }
   0x5   :  { %17 = vsyncpa [#allocation9], 0 }
   0x6   :  { %19 = vsyncpa [#allocation9 + $0x1], 0  ;;  %s991_s15 = smov 0   ;;  %s993_s16 = smov 0  }
   0x7   :  { %s995_s17 = smov 0   ;;  %s997_s18 = smov 0  }
   0x8 LB: > { %s1012_s19 = sadd.s32 4294967295, %s959_s18   ;;  %s1207_s20 = sadd.s32 4294967294, %s959_s18   ;;  %s959_s18 = sphi %s997_s18, %s1220_s18   ;;  %s955_s17 = sphi %s995_s17, %s1219_s17   ;;  %s951_s16 = sphi %s993_s16, %s1218_s16   ;;  %s947_s15 = sphi %s991_s15, %s1217_s15  }
   0x9   : > { %p45_p0 = scmp.ne.s32.totalorder %s951_s16, %s947_s15  ;;  %p46_p1 = scmp.eq.s32.totalorder %s1012_s19, 0 }
   0xa   : > { %p90_p2 = scmp.eq.s32.totalorder %s1012_s19, 1  ;;  %p96_p3 = scmp.eq.s32.totalorder %s1207_s20, 1 }
   0xb   : > { %p1023_p4 = por %p46_p1, %p45_p0  ;;  %p671_p5 = scmp.ge.s32.totalorder %s959_s18, 1 }
   0xc   : > { %p1028_p6 = por %p96_p3, %p45_p0  ;;  %p155_p7 = scmp.lt.s32.totalorder %s959_s18, 3 }
   0xd   : > { %s166_s25 = sshll.u32 %s1203_s1, 4  ;;  %s961_s27 = smov [#allocation5]   ;;  %s167_s25 = int_to_ptr.hbm [resolvable:$true] %s166_s25 }
   0xe   : > { %p1036_p8 = pnand %p671_p5, %p155_p7  ;;  %s168_s28 = sshll.u32 %s961_s27, 4  ;;  %s169_s28 = int_to_ptr.vmem [resolvable:$true] %s168_s28 }
   0xf   : > { %s1046_s29 = sadd.s32 1, %s959_s18   ;;  %s962_s30 = smov 256  }
  0x10   : > { %p710_p9 = pneg %p1036_p8  ;;  %s963_s5 = smov 16  }
  0x11   : > { %s29_s6 = ssub.s32 %s959_s18, %s1046_s29  ;;  %s32_s7 = sadd.s32 1, %s955_s17 }
  0x12   : > { %p711_p10 = pnand %p710_p9, %p46_p1  ;;  %p30_p12 = scmp.eq.s32.totalorder %s29_s6, 0 }
  0x13   : > { %p39_p13 = scmp.ne.s32.totalorder %s955_s17, %s951_s16  ;;  %p40_p0 = scmp.eq.s32.totalorder %s959_s18, 0 }
  0x14   : > { %713 = dma.hbm_to_vmem [thread:$0]  (!%p711_p10), %s167_s25, 8192, %s169_s28, [#allocation6], %s962_s30, %s962_s30, %s963_s5  }
  0x15   : > { %s1058_s8 = scalar_select %p30_p12, %s955_s17, %s32_s7  }
  0x16   : > { %p1062_p3 = por %p90_p2, %p39_p13  ;;  %p729_p5 = scmp.lt.s32.totalorder %s959_s18, 2 }
  0x17   : > { %s182_s10 = sand.u32 1, %s955_s17   ;;  %s695_s11 = sshll.u32 %s959_s18, 5 }
  0x18   : > { %p41_p7 = por %p40_p0, %p39_p13  ;;  %s674_s12 = sshll.u32 %s182_s10, 5 }
  0x19   : > { %s192_s23 = scalar_lea.hbm %s1202_s0, %s695_s11  ;;  %s186_s25 = scalar_lea.vmem [#allocation2], %s674_s12 }
  0x1a   : > { %s193_s24 = sshll.u32 %s192_s23, 4  ;;  %s195_s27 = sshll.u32 %s186_s25, 4  ;;  %s194_s24 = int_to_ptr.hbm [resolvable:$true] %s193_s24  ;;  %s196_s27 = int_to_ptr.vmem [resolvable:$true] %s195_s27 }
  0x1b   : > { %p1072_p9 = pnand %p729_p5, %p41_p7  ;;  %s183_s6 = scalar_lea.sflag [#allocation3], %s182_s10 }
  0x1c   : > { %s799_s7 = sshra.s32 %s194_s24, 4  ;;  %s806_s12 = scalar_lea.hbm %s1202_s0, 64  ;;  %s800_s7 = int_to_ptr.hbm [resolvable:$true] %s799_s7 }
  0x1d   : > { %s801_s20 = scalar_lea.hbm %s800_s7, 32  ;;  %p803_p10 = pneg %p1072_p9 }
  0x1e   : > { %p802_p2 = scmp.ne.s32.totalorder %s800_s7, %s801_s20  ;;  %p807_p0 = scmp.lt.s32.totalorder %s800_s7, %s1202_s0 }
  0x1f   : > { %p808_p5 = scmp.lt.s32.totalorder %s806_s12, %s801_s20 }
  0x20   : > { %p804_p12 = pnand %p803_p10, %p802_p2 }
  0x21   : > { %p809_p7 = por %p808_p5, %p807_p0 }
  0x22   : > { %p805_p13 = pneg %p804_p12 }
  0x24   : > { %p810_p11 = pnand %p809_p7, %p805_p13 }
  0x26   : > { %813 = shalt.err (!%p810_p11)
}
  0x27   : > { %717 = dma.hbm_to_vmem [thread:$0]  (!%p1072_p9), %s194_s24, 512, %s196_s27, %s183_s6, %s962_s30, %s962_s30, %s963_s5  }
  0x28   : > { %207 = sbr.rel (%p1036_p8) target bundleno = 258 (0x102), region = 28  ;;  %s1092_s10 = sand.u32 (!%p1036_p8), 1, %s951_s16  }
  0x29   : > { %s679_s20 = sshll.u32 (!%p1036_p8), %s1092_s10, 5  ;;  %s210_s25 = scalar_lea.sflag (!%p1036_p8), [#allocation3], %s1092_s10 }
  0x2a   : > { %s1098_s7 = scalar_lea.vmem (!%p1036_p8), [#allocation2], %s679_s20 }
  0x2d   : > { %930 = dma.done.wait (%p1023_p4), %s210_s25, 512  }
  0x2e   : > { %932 = vsyncadd (%p1023_p4), %s210_s25, 4294966784 }
  0x2f   : > { %934 = dma.done.wait (%p46_p1), [#allocation6], 8192  }
  0x30   : > { %936 = vsyncadd (%p46_p1), [#allocation6], 4294959104  ;;  %v290_v0 = vld [vmem:[#allocation5 + $0xf0] sm:$0xff]  ;;  %v291_v2 = vld [vmem:[#allocation5 + $0xf8] sm:$0xff]  ;;  %s239_s21 = scalar_lea.vmem [#allocation7], %s679_s20  ;;  %s697_s26 = sshll.u32 %s1012_s19, 5 }
  0x31   : > { %v322_v1 = vld [vmem:[#allocation5 + $0x1f0] sm:$0xff]  ;;  %324 = vmatpush.msra.mxu0 %v290_v0  ;;  %v323_v3 = vld [vmem:[#allocation5 + $0x1f8] sm:$0xff]  ;;  %v288_v4 = vld [vmem:[#allocation5 + $0xe0] sm:$0xff]  ;;  %370 = vmatpush.msra.mxu2 %v291_v2  ;;  %s492_s24 = scalar_lea.hbm %s1204_s2, %s697_s26  ;;  %s493_s27 = sshll.u32 %s239_s21, 4  ;;  %s1118_s27 = int_to_ptr.vmem [resolvable:$true] %s493_s27 }
  0x32   : > { %347 = vmatpush.msra.mxu1 %v322_v1  ;;  %v320_v5 = vld [vmem:[#allocation5 + $0x1e0] sm:$0xff]  ;;  %393 = vmatpush.msra.mxu3 %v323_v3  ;;  %v289_v6 = vld [vmem:[#allocation5 + $0xe8] sm:$0xff]  ;;  %v286_v8 = vld [vmem:[#allocation5 + $0xd0] sm:$0xff]  ;;  %s495_s28 = sshll.u32 %s492_s24, 4  ;;  %s470_s6 = scalar_lea.sflag [#allocation4], %s1092_s10  ;;  %s496_s28 = int_to_ptr.hbm [resolvable:$true] %s495_s28 }
  0x33   : > { %v321_v7 = vld [vmem:[#allocation5 + $0x1e8] sm:$0xff]  ;;  %325 = vmatpush.msra.mxu0 %v288_v4  ;;  %v318_v9 = vld [vmem:[#allocation5 + $0x1d0] sm:$0xff]  ;;  %v287_v10 = vld [vmem:[#allocation5 + $0xd8] sm:$0xff]  ;;  %371 = vmatpush.msra.mxu2 %v289_v6  ;;  %s843_s11 = sshra.s32 %s496_s28, 4  ;;  %s849_s23 = scalar_lea.hbm %s1204_s2, 64  ;;  %s844_s11 = int_to_ptr.hbm [resolvable:$true] %s843_s11 }
  0x34   : > { %348 = vmatpush.msra.mxu1 %v320_v5  ;;  %v319_v11 = vld [vmem:[#allocation5 + $0x1d8] sm:$0xff]  ;;  %394 = vmatpush.msra.mxu3 %v321_v7  ;;  %v284_v12 = vld [vmem:[#allocation5 + $0xc0] sm:$0xff]  ;;  %v285_v14 = vld [vmem:[#allocation5 + $0xc8] sm:$0xff]  ;;  %s845_s13 = scalar_lea.hbm %s844_s11, 32  ;;  %p850_p11 = scmp.lt.s32.totalorder %s844_s11, %s1204_s2 }
  0x35   : > { %v316_v13 = vld [vmem:[#allocation5 + $0x1c0] sm:$0xff]  ;;  %326 = vmatpush.msra.mxu0 %v286_v8  ;;  %v317_v15 = vld [vmem:[#allocation5 + $0x1c8] sm:$0xff]  ;;  %372 = vmatpush.msra.mxu2 %v287_v10  ;;  %v282_v16 = vld [vmem:[#allocation5 + $0xb0] sm:$0xff]  ;;  %p846_p1 = scmp.ne.s32.totalorder %s844_s11, %s845_s13  ;;  %p851_p9 = scmp.lt.s32.totalorder %s849_s23, %s845_s13 }
  0x36   : > { %349 = vmatpush.msra.mxu1 %v318_v9  ;;  %395 = vmatpush.msra.mxu3 %v319_v11  ;;  %v314_v17 = vld [vmem:[#allocation5 + $0x1b0] sm:$0xff]  ;;  %v283_v18 = vld [vmem:[#allocation5 + $0xb8] sm:$0xff]  ;;  %v280_v20 = vld [vmem:[#allocation5 + $0xa0] sm:$0xff] }
  0x37   : > { %327 = vmatpush.msra.mxu0 %v284_v12  ;;  %v315_v19 = vld [vmem:[#allocation5 + $0x1b8] sm:$0xff]  ;;  %373 = vmatpush.msra.mxu2 %v285_v14  ;;  %v312_v21 = vld [vmem:[#allocation5 + $0x1a0] sm:$0xff]  ;;  %v281_v22 = vld [vmem:[#allocation5 + $0xa8] sm:$0xff]  ;;  %p847_p4 = pnand %p846_p1, %p1062_p3  ;;  %p852_p2 = por %p851_p9, %p850_p11 }
  0x38   : > { %350 = vmatpush.msra.mxu1 %v316_v13  ;;  %396 = vmatpush.msra.mxu3 %v317_v15  ;;  %v313_v23 = vld [vmem:[#allocation5 + $0x1a8] sm:$0xff]  ;;  %v278_v24 = vld [vmem:[#allocation5 + $0x90] sm:$0xff]  ;;  %v279_v26 = vld [vmem:[#allocation5 + $0x98] sm:$0xff] }
  0x39   : > { %328 = vmatpush.msra.mxu0 %v282_v16  ;;  %374 = vmatpush.msra.mxu2 %v283_v18  ;;  %v310_v25 = vld [vmem:[#allocation5 + $0x190] sm:$0xff]  ;;  %v311_v27 = vld [vmem:[#allocation5 + $0x198] sm:$0xff]  ;;  %v276_v28 = vld [vmem:[#allocation5 + $0x80] sm:$0xff]  ;;  %p848_p8 = pneg %p847_p4 }
  0x3a   : > { %351 = vmatpush.msra.mxu1 %v314_v17  ;;  %397 = vmatpush.msra.mxu3 %v315_v19  ;;  %v308_v29 = vld [vmem:[#allocation5 + $0x180] sm:$0xff]  ;;  %v277_v30 = vld [vmem:[#allocation5 + $0x88] sm:$0xff]  ;;  %v274_v32 = vld [vmem:[#allocation5 + $0x70] sm:$0xff] }
  0x3b   : > { %329 = vmatpush.msra.mxu0 %v280_v20  ;;  %375 = vmatpush.msra.mxu2 %v281_v22  ;;  %v309_v31 = vld [vmem:[#allocation5 + $0x188] sm:$0xff]  ;;  %v306_v33 = vld [vmem:[#allocation5 + $0x170] sm:$0xff]  ;;  %v275_v34 = vld [vmem:[#allocation5 + $0x78] sm:$0xff]  ;;  %p853_p10 = pnand %p852_p2, %p848_p8 }
  0x3c   : > { %352 = vmatpush.msra.mxu1 %v312_v21  ;;  %398 = vmatpush.msra.mxu3 %v313_v23  ;;  %v307_v35 = vld [vmem:[#allocation5 + $0x178] sm:$0xff]  ;;  %v272_v36 = vld [vmem:[#allocation5 + $0x60] sm:$0xff]  ;;  %v273_v38 = vld [vmem:[#allocation5 + $0x68] sm:$0xff] }
  0x3d   : > { %330 = vmatpush.msra.mxu0 %v278_v24  ;;  %376 = vmatpush.msra.mxu2 %v279_v26  ;;  %v304_v37 = vld [vmem:[#allocation5 + $0x160] sm:$0xff]  ;;  %v305_v39 = vld [vmem:[#allocation5 + $0x168] sm:$0xff]  ;;  %v270_v40 = vld [vmem:[#allocation5 + $0x50] sm:$0xff] }
  0x3e   : > { %353 = vmatpush.msra.mxu1 %v310_v25  ;;  %399 = vmatpush.msra.mxu3 %v311_v27  ;;  %v302_v41 = vld [vmem:[#allocation5 + $0x150] sm:$0xff]  ;;  %v271_v42 = vld [vmem:[#allocation5 + $0x58] sm:$0xff]  ;;  %v268_v44 = vld [vmem:[#allocation5 + $0x40] sm:$0xff] }
  0x3f   : > { %331 = vmatpush.msra.mxu0 %v276_v28  ;;  %377 = vmatpush.msra.mxu2 %v277_v30  ;;  %v303_v43 = vld [vmem:[#allocation5 + $0x158] sm:$0xff]  ;;  %v300_v45 = vld [vmem:[#allocation5 + $0x140] sm:$0xff]  ;;  %v269_v46 = vld [vmem:[#allocation5 + $0x48] sm:$0xff] }
  0x40   : > { %354 = vmatpush.msra.mxu1 %v308_v29  ;;  %400 = vmatpush.msra.mxu3 %v309_v31  ;;  %v301_v47 = vld [vmem:[#allocation5 + $0x148] sm:$0xff]  ;;  %v266_v48 = vld [vmem:[#allocation5 + $0x30] sm:$0xff]  ;;  %v267_v50 = vld [vmem:[#allocation5 + $0x38] sm:$0xff] }
  0x41   : > { %332 = vmatpush.msra.mxu0 %v274_v32  ;;  %378 = vmatpush.msra.mxu2 %v275_v34  ;;  %v298_v49 = vld [vmem:[#allocation5 + $0x130] sm:$0xff]  ;;  %v299_v51 = vld [vmem:[#allocation5 + $0x138] sm:$0xff]  ;;  %v264_v52 = vld [vmem:[#allocation5 + $0x20] sm:$0xff] }
  0x42   : > { %355 = vmatpush.msra.mxu1 %v306_v33  ;;  %401 = vmatpush.msra.mxu3 %v307_v35  ;;  %v296_v53 = vld [vmem:[#allocation5 + $0x120] sm:$0xff]  ;;  %v265_v54 = vld [vmem:[#allocation5 + $0x28] sm:$0xff]  ;;  %v262_v56 = vld [vmem:[#allocation5 + $0x10] sm:$0xff] }
  0x43   : > { %333 = vmatpush.msra.mxu0 %v272_v36  ;;  %379 = vmatpush.msra.mxu2 %v273_v38  ;;  %v297_v55 = vld [vmem:[#allocation5 + $0x128] sm:$0xff]  ;;  %v294_v57 = vld [vmem:[#allocation5 + $0x110] sm:$0xff]  ;;  %v263_v58 = vld [vmem:[#allocation5 + $0x18] sm:$0xff] }
  0x44   : > { %356 = vmatpush.msra.mxu1 %v304_v37  ;;  %402 = vmatpush.msra.mxu3 %v305_v39  ;;  %v295_v59 = vld [vmem:[#allocation5 + $0x118] sm:$0xff]  ;;  %v260_v60 = vld [vmem:[#allocation5] sm:$0xff]  ;;  %v261_v62 = vld [vmem:[#allocation5 + $0x8] sm:$0xff] }
  0x45   : > { %334 = vmatpush.msra.mxu0 %v270_v40  ;;  %380 = vmatpush.msra.mxu2 %v271_v42  ;;  %v292_v61 = vld [vmem:[#allocation5 + $0x100] sm:$0xff]  ;;  %v293_v63 = vld [vmem:[#allocation5 + $0x108] sm:$0xff]  ;;  %v258_v2 = vld [vmem:[%s1098_s7 + $0x10] sm:$0xff] }
  0x46   : > { %357 = vmatpush.msra.mxu1 %v302_v41  ;;  %403 = vmatpush.msra.mxu3 %v303_v43  ;;  %v256_v0 = vld [vmem:[%s1098_s7] sm:$0xff]  ;;  %v257_v1 = vld [vmem:[%s1098_s7 + $0x8] sm:$0xff]  ;;  %v259_v3 = vld [vmem:[%s1098_s7 + $0x18] sm:$0xff] }
  0x47   : > { %335 = vmatpush.msra.mxu0 %v268_v44  ;;  %381 = vmatpush.msra.mxu2 %v269_v46 }
  0x48   : > { %358 = vmatpush.msra.mxu1 %v300_v45  ;;  %404 = vmatpush.msra.mxu3 %v301_v47 }
  0x49   : > { %336 = vmatpush.msra.mxu0 %v266_v48  ;;  %382 = vmatpush.msra.mxu2 %v267_v50 }
  0x4a   : > { %359 = vmatpush.msra.mxu1 %v298_v49  ;;  %405 = vmatpush.msra.mxu3 %v299_v51 }
  0x4b   : > { %337 = vmatpush.msra.mxu0 %v264_v52  ;;  %383 = vmatpush.msra.mxu2 %v265_v54 }
  0x4c   : > { %360 = vmatpush.msra.mxu1 %v296_v53  ;;  %406 = vmatpush.msra.mxu3 %v297_v55 }
  0x4d   : > { %338 = vmatpush.msra.mxu0 %v262_v56  ;;  %384 = vmatpush.msra.mxu2 %v263_v58 }
  0x4e   : > { %361 = vmatpush.msra.mxu1 %v294_v57  ;;  %407 = vmatpush.msra.mxu3 %v295_v59 }
  0x4f   : > { %339 = vmatpush.msra.mxu0 %v260_v60  ;;  %385 = vmatpush.msra.mxu2 %v261_v62 }
  0x50   : > { %362 = vmatpush.msra.mxu1 %v292_v61  ;;  %408 = vmatpush.msra.mxu3 %v293_v63 }
  0x51   : > { %340 = vmatmul.f32.vlgmr.msra.gmra.mxu0 %v256_v0  ;;  %363 = vmatmul.f32.vlgmr.msra.gmra.mxu1 %v257_v1 }
  0x52   : > { %386 = vmatmul.f32.vlgmr.msra.gmra.mxu2 %v256_v0  ;;  %409 = vmatmul.f32.vlgmr.msra.gmra.mxu3 %v257_v1 }
  0x59   : > { %343 = vmatmul.f32.gmra.mxu0 %v258_v2  ;;  %366 = vmatmul.f32.gmra.mxu1 %v259_v3 }
  0x5a   : > { %389 = vmatmul.f32.gmra.mxu2 %v258_v2  ;;  %412 = vmatmul.f32.gmra.mxu3 %v259_v3 }
  0xce   : > { %v341_v4 = vpop.f32.mrf.mxu0  ;;  %v364_v5 = vpop.f32.mrf.mxu1 }
  0xcf   : > { %v365_v6 = vadd.f32 %v364_v5, %v341_v4 }
  0xd1   : > { %416 = vst [vmem:[%s239_s21] sm:$0xff] %v365_v6  ;;  %v445_v12 = vmul.f32 %v365_v6, %v365_v6 }
  0xd5   : > { %v387_v7 = vpop.f32.mrf.mxu2  ;;  %v410_v8 = vpop.f32.mrf.mxu3 }
  0xd6   : > { %v411_v9 = vadd.f32 %v410_v8, %v387_v7  ;;  %v344_v10 = vpop.f32.mrf.mxu0  ;;  %v367_v11 = vpop.f32.mrf.mxu1 }
  0xd7   : > { %v368_v13 = vadd.f32 %v367_v11, %v344_v10 }
  0xd8   : > { %417 = vst [vmem:[%s239_s21 + $0x8] sm:$0xff] %v411_v9  ;;  %v446_v23 = vmul.f32 %v411_v9, %v411_v9 }
  0xd9   : > { %418 = vst [vmem:[%s239_s21 + $0x10] sm:$0xff] %v368_v13  ;;  %v420_v14 = vadd.f32 %v368_v13, %v365_v6  ;;  %v447_v15 = vmul.f32 %v368_v13, %v368_v13 }
  0xdb   : > { %v421_v16 = vrot.slane %v420_v14, 4  ;;  %v449_v17 = vadd.f32 %v447_v15, %v445_v12 }
  0xdd   : > { %v450_v18 = vrot.slane %v449_v17, 4  ;;  %v390_v19 = vpop.f32.mrf.mxu2  ;;  %v413_v20 = vpop.f32.mrf.mxu3  ;;  %v422_v21 = vadd.f32 %v421_v16, %v420_v14 }
  0xde   : > { %v414_v22 = vadd.f32 %v413_v20, %v390_v19 }
  0xdf   : > { %v451_v24 = vadd.f32 %v450_v18, %v449_v17 }
  0xe0   : > { %419 = vst [vmem:[%s239_s21 + $0x18] sm:$0xff] %v414_v22  ;;  %v427_v25 = vadd.f32 %v414_v22, %v411_v9  ;;  %v448_v26 = vmul.f32 %v414_v22, %v414_v22 }
  0xe1   : > { %856 = shalt.err (!%p853_p10)
}
  0xe2   : > { %s964_s7 = smov 256   ;;  %s965_s21 = smov 16   ;;  %v423_v27 = vrot.slane %v422_v21, 2  ;;  %v428_v28 = vrot.slane %v427_v25, 4  ;;  %v456_v29 = vadd.f32 %v448_v26, %v446_v23  ;;  %v452_v30 = vrot.slane %v451_v24, 2 }
  0xe3   : > { %704 = dma.vmem_to_hbm [thread:$0]  (%p1062_p3), %s1118_s27, 512, %s496_s28, %s470_s6, %s964_s7, %s964_s7, %s965_s21   ;;  %v440_v42 = vlaneseq  ;;  %vm437_vm0 = vcmask 1040384  }
  0xe4   : > { %v429_v31 = vadd.f32 %v428_v28, %v427_v25  ;;  %v457_v32 = vrot.slane %v456_v29, 4  ;;  %v424_v33 = vadd.f32 %v423_v27, %v422_v21  ;;  %s682_s26 = sshll.u32 %s1092_s10, 1  ;;  %s690_s30 = sshll.u32 %s1012_s19, 1  ;;  %v453_v36 = vadd.f32 %v452_v30, %v451_v24 }
  0xe5   : > { %s508_s11 = scalar_lea.hbm %s1205_s3, %s690_s30  ;;  %s474_s27 = sand.u32 1, %s1012_s19   ;;  %vm1141_vm1 = vcmp.lt.s32.totalorder %v440_v42, 256 }
  0xe6   : > { %v430_v34 = vrot.slane %v429_v31, 2  ;;  %v458_v35 = vadd.f32 %v457_v32, %v456_v29  ;;  %v425_v39 = vrot.slane %v424_v33, 1  ;;  %s522_s13 = scalar_lea.hbm %s1206_s4, %s690_s30  ;;  %v454_v43 = vrot.slane %v453_v36, 1  ;;  %s246_s10 = scalar_lea.vmem [#allocation8], %s682_s26 }
  0xe7   : > { %s510_s12 = sshll.u32 %s246_s10, 4  ;;  %s512_s14 = sshll.u32 %s508_s11, 4  ;;  %s511_s12 = int_to_ptr.vmem [resolvable:$true] %s510_s12  ;;  %s513_s14 = int_to_ptr.hbm [resolvable:$true] %s512_s14 }
  0xe8   : > { %v431_v37 = vadd.f32 %v430_v34, %v429_v31  ;;  %v459_v38 = vrot.slane %v458_v35, 2  ;;  %v426_v46 = vadd.f32 %v425_v39, %v424_v33  ;;  %s526_s23 = sshll.u32 %s522_s13, 4  ;;  %s253_s19 = scalar_lea.vmem [#allocation10], %s682_s26  ;;  %v455_v50 = vadd.f32 %v454_v43, %v453_v36  ;;  %s1150_s23 = int_to_ptr.hbm [resolvable:$true] %s526_s23 }
  0xe9   : > { %s524_s20 = sshll.u32 %s253_s19, 4  ;;  %s1152_s25 = scalar_lea.sflag [#allocation9], %s474_s27  ;;  %s1148_s20 = int_to_ptr.vmem [resolvable:$true] %s524_s20 }
  0xea   : > { %v432_v40 = vrot.slane %v431_v37, 1  ;;  %v460_v41 = vadd.f32 %v459_v38, %v458_v35  ;;  %s871_s7 = sshra.s32 %s513_s14, 4  ;;  %s877_s5 = scalar_lea.hbm %s1205_s3, 4  ;;  %s872_s7 = int_to_ptr.hbm [resolvable:$true] %s871_s7 }
  0xeb   : > { %s873_s21 = scalar_lea.hbm %s872_s7, 2  ;;  %p878_p5 = scmp.lt.s32.totalorder %s872_s7, %s1205_s3 }
  0xec   : > { %v433_v44 = vadd.f32 %v432_v40, %v431_v37  ;;  %v461_v45 = vrot.slane %v460_v41, 1  ;;  %p874_p12 = scmp.ne.s32.totalorder %s872_s7, %s873_s21  ;;  %p879_p7 = scmp.lt.s32.totalorder %s877_s5, %s873_s21 }
  0xee   : > { %v436_v47 = vrot.slane %v433_v44, 7  ;;  %v462_v48 = vadd.f32 %v461_v45, %v460_v41  ;;  %p875_p13 = pnand %p874_p12, %p1062_p3  ;;  %p880_p1 = por %p879_p7, %p878_p5 }
  0xf0   : > { %v465_v51 = vrot.slane %v462_v48, 7  ;;  %v438_v52 = vsel %vm437_vm0, %v426_v46, %v436_v47  ;;  %p876_p0 = pneg %p875_p13 }
  0xf1   : > { %444 = vst.msk [vmem:[%s246_s10] sm:$0x3] %vm1141_vm1, %v438_v52 }
  0xf2   : > { %p881_p4 = pnand %p880_p1, %p876_p0 }
  0xf4   : > { %884 = shalt.err (!%p881_p4)
}
  0xf5   : > { %705 = dma.vmem_to_hbm [thread:$0]  (%p1062_p3), %s511_s12, 32, %s513_s14, %s1152_s25   ;;  %v466_v53 = vsel %vm437_vm0, %v455_v50, %v465_v51 }
  0xf6   : > { %468 = vst.msk [vmem:[%s253_s19] sm:$0x3] %vm1141_vm1, %v466_v53  ;;  %s899_s27 = sshra.s32 %s1150_s23, 4  ;;  %s905_s10 = scalar_lea.hbm %s1206_s4, 4  ;;  %s900_s27 = int_to_ptr.hbm [resolvable:$true] %s899_s27 }
  0xf7   : > { %s901_s28 = scalar_lea.hbm %s900_s27, 2  ;;  %p906_p2 = scmp.lt.s32.totalorder %s900_s27, %s1206_s4 }
  0xf8   : > { %p902_p8 = scmp.ne.s32.totalorder %s900_s27, %s901_s28  ;;  %p907_p10 = scmp.lt.s32.totalorder %s905_s10, %s901_s28 }
  0xfa   : > { %p903_p11 = pnand %p902_p8, %p1062_p3  ;;  %p908_p12 = por %p907_p10, %p906_p2 }
  0xfc   : > { %p904_p9 = pneg %p903_p11 }
  0xfe   : > { %p909_p13 = pnand %p908_p12, %p904_p9 }
 0x100   : > { %912 = shalt.err (!%p909_p13)
}
 0x101   : > { %706 = dma.vmem_to_hbm [thread:$0]  (%p1062_p3), %s1148_s20, 32, %s1150_s23, %s1152_s25  }
 0x102 PF: > { %s538_s12 = sand.u32 1, %s947_s15   ;;  %p1215_p0 = scmp.ge.s32.totalorder %s959_s18, 2 }
 0x103   : > { %s539_s14 = scalar_lea.sflag [#allocation4], %s538_s12 }
 0x104   : > { %p719_p5 = pnand %p1215_p0, %p1028_p6 }
 0x106   : > { %p720_p7 = pneg %p719_p5 }
 0x108   : > { %938 = dma.done.wait (%p720_p7), %s539_s14, 512  }
 0x109   : > { %940 = vsyncadd (%p720_p7), %s539_s14, 4294966784  ;;  %s1216_s19 = sadd.s32 4294967294, %s959_s18  }
 0x10a   : > { %s548_s26 = sand.u32 1, %s1216_s19  }
 0x10b   : > { %s549_s9 = scalar_lea.sflag [#allocation9], %s548_s26 }
 0x10c   : > { %942 = dma.done.wait (%p720_p7), %s549_s9, 64  }
 0x10d   : > { %944 = vsyncadd (%p720_p7), %s549_s9, 4294967232  ;;  %p22_p3 = scmp.ge.s32.totalorder %s1046_s29, 4   ;;  %s1217_s15 = smov %s951_s16 }
 0x10e   : > { %s1218_s16 = smov %s955_s17  ;;  %s1219_s17 = smov %s1058_s8 }
 0x10f   : > { %s1220_s18 = smov %s1046_s29  ;;  %24 = sbr.rel (!%p22_p3) target bundleno = 8 (0x8), region = 109 }
 0x114   :  { %565 = vsyncpa [#allocation3], 1 }
 0x115   :  { %567 = vsyncpa [#allocation3 + $0x1], 1 }
 0x116   :  { %568 = vsyncpa [#allocation6], 1 }
 0x117   :  { %569 = vsyncpa [#allocation4], 1 }
 0x118   :  { %571 = vsyncpa [#allocation4 + $0x1], 1 }
 0x119   :  { %572 = vsyncpa [#allocation9], 1 }
 0x11a   :  { %574 = vsyncpa [#allocation9 + $0x1], 1 }

</bundles_post_ra>
